<compile_context>
chip_gen: v7x
topology: tpu7x:2x2x1
jax: 0.10.0
libtpu: 0.0.40
codegen_flags: <defaults>
</compile_context>

<pallas_src>
import jax
import jax.numpy as jnp
from jax.experimental import pallas as pl
from jax.experimental.pallas import tpu as pltpu


# --------------------------------------------------------------------------- #
# Kernel
# --------------------------------------------------------------------------- #
def _ffn_kernel(x_ref, w1_ref, b1_ref, w2_ref, b2_ref, o_ref, acc_ref):
    # x_ref : (block_rows, E)      w1_ref: (E, block_f)   b1_ref: (1, block_f)
    # w2_ref: (block_f, E)         b2_ref: (1, E)
    # o_ref : (block_rows, E)      acc_ref: (block_rows, E) f32 scratch
    f = pl.program_id(1)

    @pl.when(f == 0)
    def _():
        acc_ref[...] = jnp.zeros_like(acc_ref)

    x = x_ref[...]
    h = jnp.dot(x, w1_ref[...], preferred_element_type=jnp.float32)
    h = jnp.maximum(h + b1_ref[...].astype(jnp.float32), 0.0)
    acc_ref[...] += jnp.dot(h.astype(x.dtype), w2_ref[...],
                            preferred_element_type=jnp.float32)

    @pl.when(f == pl.num_programs(1) - 1)
    def _():
        y = acc_ref[...] + b2_ref[...].astype(jnp.float32)
        o_ref[...] = y.astype(o_ref.dtype)


# --------------------------------------------------------------------------- #
# Tiling / VMEM heuristics
# --------------------------------------------------------------------------- #
def _round_up(x, m):
    return ((x + m - 1) // m) * m


def _cdiv(a, b):
    return (a + b - 1) // b


def _vmem_capacity_bytes():
    try:
        return int(pltpu.get_tpu_info().vmem_capacity_bytes)
    except Exception:
        return 64 << 20  # conservative fallback (v7x-sized)


def _choose_tiling(rows, E, F, in_bytes):
    """Return (block_rows, block_f, vmem_capacity). block_f == F => weights resident."""
    cap = _vmem_capacity_bytes()
    budget = int(cap * 0.8)
    sublane = {4: 8, 2: 16, 1: 32}.get(in_bytes, 8)

    def max_rows(weight_bytes, bf):
        # per-row bytes: 2 x-buffers + 2 out-buffers (input dtype)
        #                + f32 accumulator + f32 h intermediate
        per_row = 4 * in_bytes * E + 4 * E + 4 * bf
        avail = budget - weight_bytes - (2 << 20)
        return avail // per_row if avail > 0 else 0

    target_rows = max(min(rows, 256), sublane)

    # Fast path: full weights resident, single-buffered (constant index maps).
    full_w = in_bytes * (2 * E * F + E + F)
    if max_rows(full_w, F) >= target_rows:
        block_f, weight_bytes = F, full_w
    else:
        # F-tiled path: weight chunks change every f-step -> double-buffered.
        def chunk_bytes(bf):
            return 2 * in_bytes * (2 * E * bf + bf + E)

        block_f = 128
        while (block_f * 2 <= F
               and max_rows(chunk_bytes(block_f * 2), block_f * 2) >= target_rows):
            block_f *= 2
        weight_bytes = chunk_bytes(block_f)

    br = int(max_rows(weight_bytes, block_f))
    br = min(br, 1024, _round_up(rows, sublane))
    # Keep the row grid >= 2 steps so v7x's two TensorCores both get work.
    if rows > sublane:
        br = min(br, max(_round_up(_cdiv(rows, 2), sublane), sublane))
    # MXU-friendly M.
    if br >= 256:
        br = (br // 256) * 256
    elif br >= 128:
        br = (br // 128) * 128
    else:
        br = max((br // sublane) * sublane, sublane)
    return br, block_f, cap


def _spec(shape, index_map, single_buffer=False):
    """BlockSpec; single-buffer blocks whose index_map is constant (never re-DMA'd)."""
    if single_buffer:
        try:
            return pl.BlockSpec(shape, index_map, pipeline_mode=pl.Buffered(1))
        except TypeError:  # older API without pipeline_mode: fall back to default
            pass
    return pl.BlockSpec(shape, index_map)


# --------------------------------------------------------------------------- #
# Wrapper: y = relu(x @ W1 + b1) @ W2 + b2 over the last axis of x
# --------------------------------------------------------------------------- #
def feed_forward(x, w1, b1, w2, b2, *, block_rows=None, block_f=None):
    """W1: (E, F), b1: (F,), W2: (F, E), b2: (E,) -- weights already in x @ W layout."""
    orig_shape = x.shape
    E = orig_shape[-1]
    F = w1.shape[-1]
    assert w1.shape == (E, F) and w2.shape == (F, E)
    assert b1.shape == (F,) and b2.shape == (E,)

    rows = 1
    for d in orig_shape[:-1]:
        rows *= d
    x2 = x.reshape(rows, E)

    in_bytes = jnp.dtype(x.dtype).itemsize
    auto_br, auto_bf, cap = _choose_tiling(rows, E, F, in_bytes)
    if block_rows is None:
        block_rows = auto_br
    if block_f is None:
        block_f = auto_bf
    block_f = min(block_f, F)

    f_steps = _cdiv(F, block_f)
    F_pad = f_steps * block_f
    if F_pad != F:
        # Zero-pad F: relu(x @ 0 + 0) == 0 and zero W2 rows contribute nothing,
        # so padded f-chunks are mathematically inert.
        w1 = jnp.pad(w1, ((0, 0), (0, F_pad - F)))
        b1 = jnp.pad(b1, ((0, F_pad - F),))
        w2 = jnp.pad(w2, ((0, F_pad - F), (0, 0)))

    b1_2 = b1.reshape(1, F_pad)
    b2_2 = b2.reshape(1, E)

    weights_resident = f_steps == 1
    grid = (_cdiv(rows, block_rows), f_steps)

    # VMEM request: x/out tiles (double-buffered), weight chunks (single-buffered
    # when resident, else double), f32 accumulator + h intermediate, plus headroom.
    weight_buffers = 1 if weights_resident else 2
    needed = (
        4 * block_rows * E * in_bytes
        + weight_buffers * in_bytes * (2 * E * block_f + block_f + E)
        + 4 * block_rows * (E + block_f)
        + (4 << 20)
    )
    vmem_limit = int(min(max(needed, 16 << 20), int(cap * 0.9)))

    cost = pl.CostEstimate(
        flops=4 * rows * E * F,
        transcendentals=0,
        bytes_accessed=(2 * rows * E * in_bytes
                        + in_bytes * (2 * E * F + E + F)),
    )

    out = pl.pallas_call(
        _ffn_kernel,
        out_shape=jax.ShapeDtypeStruct((rows, E), x.dtype),
        grid_spec=pltpu.PrefetchScalarGridSpec(
            num_scalar_prefetch=0,
            grid=grid,
            in_specs=[
                _spec((block_rows, E), lambda i, f: (i, 0)),
                _spec((E, block_f), lambda i, f: (0, f), single_buffer=weights_resident),
                _spec((1, block_f), lambda i, f: (0, f), single_buffer=weights_resident),
                _spec((block_f, E), lambda i, f: (f, 0), single_buffer=weights_resident),
                _spec((1, E), lambda i, f: (0, 0), single_buffer=True),
            ],
            out_specs=pl.BlockSpec((block_rows, E), lambda i, f: (i, 0)),
            scratch_shapes=[pltpu.VMEM((block_rows, E), jnp.float32)],
        ),
        compiler_params=pltpu.CompilerParams(
            dimension_semantics=("parallel", "arbitrary"),
            vmem_limit_bytes=vmem_limit,
        ),
        cost_estimate=cost,
    )(x2, w1, b1_2, w2, b2_2)

    return out.reshape(orig_shape)


# --------------------------------------------------------------------------- #
# Self-test
# --------------------------------------------------------------------------- #
if __name__ == "__main__":
    key = jax.random.PRNGKey(0)
    batch, seq, embedding_dim, feed_forward_dim = 2, 8, 32, 64

    kx, kw1, kb1, kw2, kb2 = jax.random.split(key, 5)
    x = jax.random.normal(kx, (batch, seq, embedding_dim), dtype=jnp.float32)
    # Weights stored directly in x @ W layout: W1:(E,F), W2:(F,E).
    w1 = 0.1 * jax.random.normal(kw1, (embedding_dim, feed_forward_dim), dtype=jnp.float32)
    b1 = 0.1 * jax.random.normal(kb1, (feed_forward_dim,), dtype=jnp.float32)
    w2 = 0.1 * jax.random.normal(kw2, (feed_forward_dim, embedding_dim), dtype=jnp.float32)
    b2 = 0.1 * jax.random.normal(kb2, (embedding_dim,), dtype=jnp.float32)

    y = feed_forward(x, w1, b1, w2, b2)
    jax.block_until_ready(y)

    # Plain-JAX reference: Linear -> ReLU -> Linear (full-precision matmuls).
    hp = jax.lax.Precision.HIGHEST
    h_ref = jnp.maximum(jnp.dot(x, w1, precision=hp) + b1, 0.0)
    y_ref = jnp.dot(h_ref, w2, precision=hp) + b2
    assert y.shape == y_ref.shape
    assert jnp.allclose(y, y_ref, atol=1e-3, rtol=1e-3), "mismatch vs reference"

    print("KERNEL_OK")
</pallas_src>

<mosaic_0001>
module attributes {stable_mosaic.version = 11 : i64} {
  func.func @_ffn_kernel(%arg0: i32, %arg1: i32, %arg2: memref<8x32xf32, #tpu.memory_space<vmem>>, %arg3: memref<32x64xf32, #tpu.memory_space<vmem>>, %arg4: memref<1x64xf32, #tpu.memory_space<vmem>>, %arg5: memref<64x32xf32, #tpu.memory_space<vmem>>, %arg6: memref<1x32xf32, #tpu.memory_space<vmem>>, %arg7: memref<8x32xf32, #tpu.memory_space<vmem>>, %arg8: memref<8x32xf32, #tpu.memory_space<vmem>>) attributes {dimension_semantics = [#tpu.dimension_semantics<parallel>, #tpu.dimension_semantics<arbitrary>], iteration_bounds = array<i64: 2, 1>, scalar_prefetch = 0 : i64, scratch_operands = 1 : i64, tpu.core_type = #tpu.core_type<tc>, window_params = [{transform_indices = @transform_0, window_bounds = array<i64: 8, 32>}, {pipeline_mode = #tpu.pipeline_mode<synchronous>, transform_indices = @transform_1, window_bounds = array<i64: 32, 64>}, {pipeline_mode = #tpu.pipeline_mode<synchronous>, transform_indices = @transform_2, window_bounds = array<i64: 1, 64>}, {pipeline_mode = #tpu.pipeline_mode<synchronous>, transform_indices = @transform_3, window_bounds = array<i64: 64, 32>}, {pipeline_mode = #tpu.pipeline_mode<synchronous>, transform_indices = @transform_4, window_bounds = array<i64: 1, 32>}, {transform_indices = @transform_5, window_bounds = array<i64: 8, 32>}]} {
    %c0_i32 = arith.constant 0 : i32
    %0 = arith.cmpi eq, %arg1, %c0_i32 : i32
    %1 = arith.extui %0 : i1 to i32
    %c0_i32_0 = arith.constant 0 : i32
    %2 = arith.cmpi ne, %1, %c0_i32_0 : i32
    scf.if %2 {
      %cst_16 = arith.constant 0.000000e+00 : f32
      %19 = vector.broadcast %cst_16 : f32 to vector<8x32xf32>
      %c0_17 = arith.constant 0 : index
      %c0_18 = arith.constant 0 : index
      %20 = vector.load %arg8[%c0_17, %c0_18] : memref<8x32xf32, #tpu.memory_space<vmem>>, vector<8x32xf32>
      tpu.vector_store %arg8[%c0_17, %c0_18], %19 {strides = array<i32>} : memref<8x32xf32, #tpu.memory_space<vmem>>, vector<8x32xf32>,
    } else {
    }
    %c0 = arith.constant 0 : index
    %c0_1 = arith.constant 0 : index
    %3 = vector.load %arg2[%c0, %c0_1] : memref<8x32xf32, #tpu.memory_space<vmem>>, vector<8x32xf32>
    %c0_2 = arith.constant 0 : index
    %c0_3 = arith.constant 0 : index
    %4 = vector.load %arg3[%c0_2, %c0_3] : memref<32x64xf32, #tpu.memory_space<vmem>>, vector<32x64xf32>
    %cst = arith.constant dense<0.000000e+00> : vector<8x64xf32>
    %5 = tpu.matmul %3, %4, %cst {dimension_numbers = #tpu.dot_dimension_numbers<[1], [0], [0], [1], [0, 0, 1, 1], [], []>} : vector<8x32xf32>, vector<32x64xf32>, vector<8x64xf32> -> vector<8x64xf32>
    %c0_4 = arith.constant 0 : index
    %c0_5 = arith.constant 0 : index
    %6 = vector.load %arg4[%c0_4, %c0_5] : memref<1x64xf32, #tpu.memory_space<vmem>>, vector<1x64xf32>
    %7 = vector.broadcast %6 : vector<1x64xf32> to vector<8x64xf32>
    %8 = arith.addf %5, %7 : vector<8x64xf32>
    %cst_6 = arith.constant 0.000000e+00 : f32
    %9 = vector.broadcast %cst_6 : f32 to vector<8x64xf32>
    %10 = arith.maximumf %8, %9 : vector<8x64xf32>
    %c0_7 = arith.constant 0 : index
    %c0_8 = arith.constant 0 : index
    %11 = vector.load %arg8[%c0_7, %c0_8] : memref<8x32xf32, #tpu.memory_space<vmem>>, vector<8x32xf32>
    %c0_9 = arith.constant 0 : index
    %c0_10 = arith.constant 0 : index
    %12 = vector.load %arg5[%c0_9, %c0_10] : memref<64x32xf32, #tpu.memory_space<vmem>>, vector<64x32xf32>
    %cst_11 = arith.constant dense<0.000000e+00> : vector<8x32xf32>
    %13 = tpu.matmul %10, %12, %cst_11 {dimension_numbers = #tpu.dot_dimension_numbers<[1], [0], [0], [1], [0, 0, 1, 1], [], []>} : vector<8x64xf32>, vector<64x32xf32>, vector<8x32xf32> -> vector<8x32xf32>
    %14 = arith.addf %11, %13 : vector<8x32xf32>
    %c0_12 = arith.constant 0 : index
    %c0_13 = arith.constant 0 : index
    %15 = vector.load %arg8[%c0_12, %c0_13] : memref<8x32xf32, #tpu.memory_space<vmem>>, vector<8x32xf32>
    tpu.vector_store %arg8[%c0_12, %c0_13], %14 {strides = array<i32>} : memref<8x32xf32, #tpu.memory_space<vmem>>, vector<8x32xf32>,
    %c0_i32_14 = arith.constant 0 : i32
    %16 = arith.cmpi eq, %arg1, %c0_i32_14 : i32
    %17 = arith.extui %16 : i1 to i32
    %c0_i32_15 = arith.constant 0 : i32
    %18 = arith.cmpi ne, %17, %c0_i32_15 : i32
    scf.if %18 {
      %c0_16 = arith.constant 0 : index
      %c0_17 = arith.constant 0 : index
      %19 = vector.load %arg8[%c0_16, %c0_17] : memref<8x32xf32, #tpu.memory_space<vmem>>, vector<8x32xf32>
      %c0_18 = arith.constant 0 : index
      %c0_19 = arith.constant 0 : index
      %20 = vector.load %arg6[%c0_18, %c0_19] : memref<1x32xf32, #tpu.memory_space<vmem>>, vector<1x32xf32>
      %21 = vector.broadcast %20 : vector<1x32xf32> to vector<8x32xf32>
      %22 = arith.addf %19, %21 : vector<8x32xf32>
      %c0_20 = arith.constant 0 : index
      %c0_21 = arith.constant 0 : index
      %23 = vector.load %arg7[%c0_20, %c0_21] : memref<8x32xf32, #tpu.memory_space<vmem>>, vector<8x32xf32>
      tpu.vector_store %arg7[%c0_20, %c0_21], %22 {strides = array<i32>} : memref<8x32xf32, #tpu.memory_space<vmem>>, vector<8x32xf32>,
    } else {
    }
    return
  }
  func.func @transform_0(%arg0: i32, %arg1: i32) -> (i32, i32) {
    %c0_i32 = arith.constant 0 : i32
    %c0_i32_0 = arith.constant 0 : i32
    return %arg0, %c0_i32 : i32, i32
  }
  func.func @transform_1(%arg0: i32, %arg1: i32) -> (i32, i32) {
    %c0_i32 = arith.constant 0 : i32
    %c0_i32_0 = arith.constant 0 : i32
    return %c0_i32, %arg1 : i32, i32
  }
  func.func @transform_2(%arg0: i32, %arg1: i32) -> (i32, i32) {
    %c0_i32 = arith.constant 0 : i32
    %c0_i32_0 = arith.constant 0 : i32
    return %c0_i32, %arg1 : i32, i32
  }
  func.func @transform_3(%arg0: i32, %arg1: i32) -> (i32, i32) {
    %c0_i32 = arith.constant 0 : i32
    %c0_i32_0 = arith.constant 0 : i32
    return %arg1, %c0_i32 : i32, i32
  }
  func.func @transform_4(%arg0: i32, %arg1: i32) -> (i32, i32) {
    %c0_i32 = arith.constant 0 : i32
    %c0_i32_0 = arith.constant 0 : i32
    %c0_i32_1 = arith.constant 0 : i32
    return %c0_i32, %c0_i32_0 : i32, i32
  }
  func.func @transform_5(%arg0: i32, %arg1: i32) -> (i32, i32) {
    %c0_i32 = arith.constant 0 : i32
    %c0_i32_0 = arith.constant 0 : i32
    return %arg0, %c0_i32 : i32, i32
  }
}

</mosaic_0001>

<bundles_post_ra>
// kernel: tpu_custom_call.1
= control target key start
LH: loop header
LB: loop body
LE: loop exit
PB: predicated region body
PF: predicated region fallthrough
CT: control target
= control target key end

     0   :  { %10 = vsyncpa [#allocation4], 0  ;;  %s1009_s0 = inlined_call_operand.vmem [shape: f32[16,32], index: 0, kind: input, shape index: {}]   ;;  %s1010_s1 = inlined_call_operand.vmem [shape: f32[32,64], index: 1, kind: input, shape index: {}]   ;;  %s1011_s2 = inlined_call_operand.vmem [shape: f32[1,64], index: 2, kind: input, shape index: {}]   ;;  %s1012_s3 = inlined_call_operand.vmem [shape: f32[64,32], index: 3, kind: input, shape index: {}]   ;;  %s1013_s4 = inlined_call_operand.vmem [shape: f32[1,32], index: 4, kind: input, shape index: {}]   ;;  %s1014_s5 = inlined_call_operand.hbm [shape: f32[16,32], index: 5, kind: output, shape index: {}]  }
   0x1   :  { %12 = vsyncpa [#allocation4 + $0x1], 0  ;;  %s851_s18 = smov 0   ;;  %s853_s19 = smov 0  }
   0x2   :  { %s855_s20 = smov 0   ;;  %s857_s21 = smov 0  }
   0x3   :  { %s859_s22 = smov 0   ;;  %s861_s23 = smov 0  }
   0x4 LB: > { %s599_s24 = sadd.s32 4294967295, %s815_s23   ;;  %s600_s25 = sadd.s32 4294967294, %s815_s23   ;;  %s815_s23 = sphi %s861_s23, %s18_s23   ;;  %s811_s22 = sphi %s859_s22, %s1021_s22   ;;  %s807_s21 = sphi %s857_s21, %s1020_s21   ;;  %s803_s20 = sphi %s855_s20, %s1019_s20   ;;  %s799_s19 = sphi %s853_s19, %s1018_s19   ;;  %s795_s18 = sphi %s851_s18, %s1017_s18  }
   0x5   : > { %s30_s26 = sadd.s32 1, %s811_s22  ;;  %s162_s27 = sadd.s32 1, %s803_s20 }
   0x6   : > { %p32_p0 = scmp.ge.s32.totalorder %s30_s26, 2  ;;  %p172_p1 = scmp.ne.s32.totalorder %s803_s20, %s799_s19 }
   0x7   : > { %p173_p2 = scmp.eq.s32.totalorder %s599_s24, 1  ;;  %p178_p3 = scmp.ne.s32.totalorder %s799_s19, %s795_s18 }
   0x8   : > { %s1023_s26 = smov (%p32_p0, %s30_s26), 0  ;;  %p179_p5 = scmp.eq.s32.totalorder %s600_s25, 1 }
   0x9   : > { %p891_p4 = por %p173_p2, %p172_p1  ;;  %s159_s29 = ssub.s32 %s811_s22, %s1023_s26 }
   0xa   : > { %p606_p6 = scmp.ge.s32.totalorder %s815_s23, 1  ;;  %p160_p7 = scmp.eq.s32.totalorder %s159_s29, 0 }
   0xb   : > { %p898_p8 = por %p179_p5, %p178_p3  ;;  %p229_p9 = scmp.lt.s32.totalorder %s815_s23, 3 }
   0xc   : > { %s904_s6 = scalar_select %p160_p7, %s803_s20, %s162_s27  }
   0xd   : > { %p230_p10 = pnand %p606_p6, %p229_p9 }
   0xe   : > { %v292_v0 = vld [vmem:[%s1010_s1] sm:$0xff] (!%p230_p10)  ;;  %v293_v1 = vld [vmem:[%s1010_s1 + $0x8] sm:$0xff] (!%p230_p10)  ;;  %v294_v2 = vld [vmem:[%s1010_s1 + $0x10] sm:$0xff] (!%p230_p10)  ;;  %v817_v3 = vmov (!%p230_p10), 0.0|0.0   ;;  %vm818_vm0 = vmmov (!%p230_p10), 0   ;;  %v819_v6 = vmov (!%p230_p10), 0.0  }
   0xf   : > { %233 = sbr.rel (%p230_p10) target bundleno = 481 (0x1e1), region = 40  ;;  %661 = vmatprep.subr.bf16.mxu0 (!%p230_p10), %v817_v3  ;;  %v662_v4 = vpack.c.bf16 (!%p230_p10), %v293_v1, %v292_v0  ;;  %v295_v5 = vld [vmem:[%s1010_s1 + $0x18] sm:$0xff] (!%p230_p10)  ;;  %639 = vmatprep.mubr.msk.f32.mxu0 (!%p230_p10), %vm818_vm0, %v819_v6  ;;  %p268_p11 = scmp.lt.s32.totalorder (!%p230_p10), %s807_s21, 1  ;;  %vm289_vm1 = vcmask (!%p230_p10), 261120   ;;  %v379_v7 = vld [vmem:[%s1012_s3] sm:$0xff] (!%p230_p10)  ;;  %v380_v8 = vld [vmem:[%s1012_s3 + $0x8] sm:$0xff] (!%p230_p10) }
  0x10   : > { %290 = vst.msk [vmem:[#allocation2] sm:$0xff] (!%p230_p10), %vm289_vm1, %v819_v6  ;;  %667 = vmatprep.subr.bf16.mxu1 (!%p230_p10), %v817_v3  ;;  %v668_v9 = vpack.c.bf16 (!%p230_p10), %v380_v8, %v379_v7  ;;  %v381_v10 = vld [vmem:[%s1012_s3 + $0x10] sm:$0xff] (!%p230_p10)  ;;  %v382_v11 = vld [vmem:[%s1012_s3 + $0x18] sm:$0xff] (!%p230_p10)  ;;  %658 = vmatprep.mubr.msk.f32.mxu1 (!%p230_p10), %vm818_vm0, %v819_v6  ;;  %v665_v12 = vpack.c.bf16 (!%p230_p10), %v295_v5, %v294_v2  ;;  %v383_v14 = vld [vmem:[%s1012_s3 + $0x20] sm:$0xff] (!%p230_p10)  ;;  %vm387_vm2 = vcmask (!%p230_p10), 523264   ;;  %s614_s12 = sshll.u32 (!%p230_p10), %s807_s21, 7 }
  0x11   : > { %663 = vmatpush3.bf16.msra.mxu0 (!%p230_p10), %v662_v4  ;;  %v671_v13 = vpack.c.bf16 (!%p230_p10), %v382_v11, %v381_v10  ;;  %v384_v15 = vld [vmem:[%s1012_s3 + $0x28] sm:$0xff] (!%p230_p10)  ;;  %v385_v18 = vld [vmem:[%s1012_s3 + $0x30] sm:$0xff] (!%p230_p10)  ;;  %v386_v19 = vld [vmem:[%s1012_s3 + $0x38] sm:$0xff] (!%p230_p10)  ;;  %s961_s17 = scalar_lea.hbm (!%p230_p10), %s1014_s5, %s614_s12 }
  0x12   : > { %664 = vmatprep.subr.bf16.mxu0 (!%p230_p10), %v817_v3  ;;  %669 = vmatpush3.bf16.msra.mxu1 (!%p230_p10), %v668_v9  ;;  %v674_v17 = vpack.c.bf16 (!%p230_p10), %v384_v15, %v383_v14  ;;  %v677_v20 = vpack.c.bf16 (!%p230_p10), %v386_v19, %v385_v18  ;;  %v609_v21 = vld [vmem:[%s1011_s2] ss:$0 sm:$0xff] (!%p230_p10) }
  0x13   : > { %670 = vmatprep.subr.bf16.mxu1 (!%p230_p10), %v817_v3  ;;  %v612_v30 = vld [vmem:[%s1013_s4] ss:$0 sm:$0xff] (!%p230_p10) }
  0x15   : > { %666 = vmatpush3.bf16.msra.mxu0 (!%p230_p10), %v665_v12 }
  0x16   : > { %s269_s8 = scalar_select %p268_p11, %s807_s21, 1  ;;  %672 = vmatpush3.bf16.msra.mxu1 %v671_v13 }
  0x17   : > { %673 = vmatprep.subr.bf16.mxu1 %v817_v3  ;;  %v378_v26 = vld [vmem:[#allocation2] sm:$0xff]  ;;  %s820_s21 = smov [#allocation3]  }
  0x18   : > { %s608_s9 = sshll.u32 %s269_s8, 3  ;;  %s265_s8 = sand.u32 1, %s799_s19  }
  0x19   : > { %s271_s16 = scalar_lea.vmem %s1009_s0, %s608_s9  ;;  %s607_s9 = sshll.u32 %s265_s8, 3 }
  0x1a   : > { %v291_v16 = vld [vmem:[%s271_s16] sm:$0xff]  ;;  %675 = vmatpush3.bf16.msra.mxu1 %v674_v17  ;;  %s267_s13 = scalar_lea.vmem [#allocation3], %s607_s9  ;;  %s477_s24 = scalar_lea.sflag [#allocation4], %s265_s8 }
  0x1b   : > { %640 = vmatmul.mubr.msk.f32.vlgmr.msra.gmra.mrb[0].mxu0 %vm289_vm1, %v291_v16  ;;  %676 = vmatprep.subr.bf16.mxu1 %v817_v3  ;;  %s490_s14 = sshll.u32 %s267_s13, 4  ;;  %s741_s27 = sshll.u32 %s820_s21, 4  ;;  %s963_s14 = int_to_ptr.vmem [resolvable:$true] %s490_s14  ;;  %s742_s27 = int_to_ptr.vmem [resolvable:$false] %s741_s27 }
  0x1c   : > { %s737_s25 = scalar_lea.vmem %s963_s14, 128  ;;  %s743_s29 = scalar_lea.vmem %s742_s27, 256 }
  0x1d   : > { %p738_p12 = scmp.ne.s32.totalorder %s963_s14, %s737_s25  ;;  %p744_p1 = scmp.lt.s32.totalorder %s963_s14, %s742_s27 }
  0x1e   : > { %678 = vmatpush3.bf16.msra.mxu1 %v677_v20  ;;  %p745_p2 = scmp.lt.s32.totalorder %s743_s29, %s737_s25 }
  0x1f   : > { %p739_p13 = pnand %p738_p12, %p891_p4 }
  0x20   : > { %p746_p3 = por %p745_p2, %p744_p1 }
  0x21   : > { %p740_p0 = pneg %p739_p13 }
  0x23   : > { %p747_p5 = pnand %p746_p3, %p740_p0 }
  0xee   : > { %v373_v22 = vpop.f32.mrb[0].mxu0 }
  0xef   : > { %v374_v23 = vadd.f32 %v609_v21, %v373_v22  ;;  %v641_v24 = vpop.f32.mrb[1].mxu0 }
  0xf1   : > { %v377_v25 = vmax.f32 %v374_v23, 0.0 }
  0xf3   : > { %659 = vmatmul.mubr.msk.f32.vlgmr.msra.gmra.mrb[0].mxu1 %vm387_vm2, %v377_v25 }
 0x1c6   : > { %v457_v27 = vpop.f32.mrb[0].mxu1 }
 0x1c7   : > { %v461_v28 = vadd.f32 %v457_v27, %v378_v26  ;;  %v660_v29 = vpop.f32.mrb[1].mxu1 }
 0x1c9   : > { %462 = vst.msk [vmem:[#allocation2] sm:$0xff] %vm289_vm1, %v461_v28 }
 0x1d0   : > { %v466_v31 = vld [vmem:[#allocation2] sm:$0xff] }
 0x1d1   : > { %v474_v32 = vadd.f32 %v612_v30, %v466_v31 }
 0x1d3   : > { %475 = vst.msk [vmem:[%s267_s13] sm:$0xff] %vm289_vm1, %v474_v32 }
 0x1d4   : > { %750 = shalt.err (!%p747_p5)
}
 0x1d5   : > { %s751_s7 = scalar_lea.hbm %s961_s17, 128  ;;  %s755_s10 = scalar_lea.hbm %s1014_s5, 256 }
 0x1d6   : > { %p752_p6 = scmp.ne.s32.totalorder %s961_s17, %s751_s7  ;;  %p756_p10 = scmp.lt.u32.totalorder %s961_s17, %s1014_s5 }
 0x1d7   : > { %p757_p11 = scmp.lt.u32.totalorder %s755_s10, %s751_s7  ;;  %p759_p13 = scmp.lt.u32.totalorder %s751_s7, %s961_s17 }
 0x1d8   : > { %p753_p7 = pnand %p752_p6, %p891_p4 }
 0x1d9   : > { %p758_p12 = por %p757_p11, %p756_p10 }
 0x1da   : > { %p754_p9 = pneg %p753_p7 }
 0x1db   : > { %p760_p0 = por %p759_p13, %p758_p12 }
 0x1dd   : > { %p761_p1 = pnand %p760_p0, %p754_p9 }
 0x1df   : > { %764 = shalt.err (!%p761_p1)
}
 0x1e0   : > { %679 = dma.vmem_to_hbm [thread:$0]  (%p891_p4), %s963_s14, 128, %s961_s17, %s477_s24  }
 0x1e1 PF: > { %p685_p2 = scmp.ge.s32.totalorder %s815_s23, 2  ;;  %s502_s13 = sand.u32 1, %s795_s18  }
 0x1e2   : > { %s503_s15 = scalar_lea.sflag [#allocation4], %s502_s13 }
 0x1e3   : > { %p682_p3 = pnand %p685_p2, %p898_p8 }
 0x1e5   : > { %790 = dma.done.wait (!%p682_p3), %s503_s15, 128  }
 0x1e6   : > { %792 = vsyncadd (!%p682_p3), %s503_s15, 4294967168  ;;  %s18_s23 = sadd.s32 1, %s815_s23   ;;  %s1017_s18 = smov %s799_s19 }
 0x1e7   : > { %p15_p5 = scmp.ge.s32.totalorder %s18_s23, 4   ;;  %s1018_s19 = smov %s803_s20 }
 0x1e8   : > { %s1019_s20 = smov %s904_s6  ;;  %s1020_s21 = smov %s811_s22 }
 0x1e9   : > { %s1021_s22 = smov %s1023_s26  ;;  %17 = sbr.rel (!%p15_p5) target bundleno = 4 (0x4), region = 92 }
 0x1f0   :  { %508 = vsyncpa [#allocation4], 1 }
 0x1f1   :  { %510 = vsyncpa [#allocation4 + $0x1], 1 }

</bundles_post_ra>
